<compile_context>
chip_gen: v5e
topology: v5e:2x2
jax: 0.10.0
libtpu: 0.0.40
codegen_flags: <defaults>
</compile_context>

<pallas_src>
import math
import jax
import jax.numpy as jnp
from jax.experimental import pallas as pl
from jax.experimental.pallas import tpu as pltpu


def _prenorm_kernel(x_ref, w_ref, b_ref, o_ref):
    # x_ref: (1, C, TL) tile; w_ref: (C, C) bf16 (gain pre-folded);
    # b_ref: (C, 1) f32; o_ref: (1, C, TL)
    x = x_ref[0].astype(jnp.float32)                       # (C, TL)

    # F.normalize(x, dim=1): x / max(||x||_2, 1e-12)  ==  x * rsqrt(max(sumsq, 1e-24))
    sumsq = jnp.sum(x * x, axis=0, keepdims=True)          # (1, TL)  XLU reduce
    inv = jax.lax.rsqrt(jnp.maximum(sumsq, jnp.float32(1e-24)))  # EUP rsqrt
    xn = (x * inv).astype(jnp.bfloat16)                    # (C, TL), MXU operand

    # fn: pointwise Conv1d(dim, dim, 1) == W_scaled @ xn + b (f32 accumulation)
    out = jnp.dot(w_ref[...], xn, preferred_element_type=jnp.float32)
    o_ref[0] = (out + b_ref[...].astype(jnp.float32)).astype(o_ref.dtype)


def _pick_tile_l(C, l128, tl, itemsize):
    """Largest multiple-of-128 L tile such that the streamed, double-buffered
    in/out tiles plus in-kernel f32 temporaries fit a ~24 MiB VMEM budget."""
    # per output-column bytes: 2x in tile + 2x out tile (double-buffered)
    # + ~12 B/elem for f32 x, f32 out accum, bf16 xn temporaries.
    per_col = C * (2 * itemsize + 2 * itemsize + 12)
    budget = 24 * 1024 * 1024 - 2 * C * C - 4 * C          # leave W/b resident
    cap = max(128, (max(budget, per_col * 128) // per_col) // 128 * 128)
    TL = min(max(tl, 128), l128, cap)
    return 128 * (TL // 128)


def prenorm(x, g, w, b, *, tl=512):
    """x: (B, C, L); g: (1, C, 1); w: (C, C); b: (C, 1)."""
    B, C, L = x.shape
    dtype = x.dtype

    # Fold the RMSNorm gain into the conv weight:  W @ diag(g*sqrt(C))
    scale = g.reshape(1, C).astype(jnp.float32) * jnp.float32(math.sqrt(C))
    w_scaled = (w.astype(jnp.float32) * scale).astype(jnp.bfloat16)   # (C, C)
    b32 = b.astype(jnp.float32)                                       # (C, 1)

    # Lane-dense tiling: pad L up to a multiple of 128, pick TL, pad to TL.
    l128 = 128 * pl.cdiv(L, 128)
    TL = _pick_tile_l(C, l128, tl, jnp.dtype(dtype).itemsize)
    Lp = TL * pl.cdiv(l128, TL)
    if Lp != L:
        # Zero-padded columns: sumsq=0 -> clamped -> xn=0 -> out=b; sliced off below.
        x = jnp.pad(x, ((0, 0), (0, 0), (0, Lp - L)))

    # TODO(synk): for C << 128 the MXU tile is mostly empty; batching several B
    # elements per tile (or a VPU MAC) would use the array better.
    out = pl.pallas_call(
        _prenorm_kernel,
        out_shape=jax.ShapeDtypeStruct((B, C, Lp), dtype),
        grid_spec=pltpu.PrefetchScalarGridSpec(
            num_scalar_prefetch=0,
            grid=(B, Lp // TL),
            in_specs=[
                pl.BlockSpec((1, C, TL), lambda bi, li: (bi, 0, li)),
                pl.BlockSpec((C, C), lambda bi, li: (0, 0)),   # resident weight
                pl.BlockSpec((C, 1), lambda bi, li: (0, 0)),   # resident bias
            ],
            out_specs=pl.BlockSpec((1, C, TL), lambda bi, li: (bi, 0, li)),
        ),
        compiler_params=pltpu.CompilerParams(
            dimension_semantics=("parallel", "parallel")),
    )(x, w_scaled, b32)

    return out[:, :, :L] if Lp != L else out


def _reference(x, g, w, b):
    C = x.shape[1]
    norm = jnp.maximum(jnp.sqrt(jnp.sum(x * x, axis=1, keepdims=True)), 1e-12)
    xn = x / norm * g * math.sqrt(C)
    return jnp.einsum('oc,bcl->bol', w, xn) + b[None, :, :]


if __name__ == "__main__":
    B, C, L = 2, 4, 16  # small NCL shapes consistent with g: (1, dim, 1)
    key = jax.random.PRNGKey(0)
    kx, kw, kb = jax.random.split(key, 3)

    x = jax.random.normal(kx, (B, C, L), dtype=jnp.float32)
    # Deterministic parameter init: RMSNorm g starts at ones (as in __init__);
    # fn (1x1 conv) weights/bias drawn deterministically from PRNGKey(0).
    g = jnp.ones((1, C, 1), dtype=jnp.float32)
    w = jax.random.normal(kw, (C, C), dtype=jnp.float32) * 0.1
    b = jax.random.normal(kb, (C, 1), dtype=jnp.float32) * 0.1

    out = prenorm(x, g, w, b)
    jax.block_until_ready(out)

    ref = _reference(x, g, w, b)
    # bf16 MXU operands with f32 accumulation -> loosen tolerance slightly.
    assert out.shape == ref.shape, "shape mismatch vs reference"
    assert jnp.allclose(out, ref, atol=2e-2, rtol=2e-2), "mismatch vs reference"
    print("KERNEL_OK")
</pallas_src>

<mosaic_0001>
module attributes {stable_mosaic.version = 11 : i64} {
  func.func @_prenorm_kernel(%arg0: i32, %arg1: i32, %arg2: memref<1x4x128xf32, #tpu.memory_space<vmem>>, %arg3: memref<4x4xbf16, #tpu.memory_space<vmem>>, %arg4: memref<4x1xf32, #tpu.memory_space<vmem>>, %arg5: memref<1x4x128xf32, #tpu.memory_space<vmem>>) attributes {dimension_semantics = [#tpu.dimension_semantics<parallel>, #tpu.dimension_semantics<parallel>], iteration_bounds = array<i64: 2, 1>, scalar_prefetch = 0 : i64, scratch_operands = 0 : i64, tpu.core_type = #tpu.core_type<tc>, window_params = [{transform_indices = @transform_0, window_bounds = array<i64: 1, 4, 128>}, {pipeline_mode = #tpu.pipeline_mode<synchronous>, transform_indices = @transform_1, window_bounds = array<i64: 4, 4>}, {pipeline_mode = #tpu.pipeline_mode<synchronous>, transform_indices = @transform_2, window_bounds = array<i64: 4, 1>}, {transform_indices = @transform_3, window_bounds = array<i64: 1, 4, 128>}]} {
    %c0 = arith.constant 0 : index
    %c0_0 = arith.constant 0 : index
    %c0_1 = arith.constant 0 : index
    %0 = vector.load %arg2[%c0, %c0_0, %c0_1] : memref<1x4x128xf32, #tpu.memory_space<vmem>>, vector<1x4x128xf32>
    %1 = vector.shape_cast %0 : vector<1x4x128xf32> to vector<4x128xf32>
    %2 = arith.mulf %1, %1 : vector<4x128xf32>
    %cst = arith.constant dense<0.000000e+00> : vector<128xf32>
    %3 = vector.multi_reduction <add>, %2, %cst [0] : vector<4x128xf32> to vector<128xf32>
    %4 = vector.shape_cast %3 : vector<128xf32> to vector<1x128xf32>
    %cst_2 = arith.constant 1.000000e-24 : f32
    %5 = vector.broadcast %cst_2 : f32 to vector<1x128xf32>
    %6 = arith.maximumf %4, %5 : vector<1x128xf32>
    %7 = math.rsqrt %6 : vector<1x128xf32>
    %8 = vector.broadcast %7 : vector<1x128xf32> to vector<4x128xf32>
    %9 = arith.mulf %1, %8 : vector<4x128xf32>
    %10 = arith.truncf %9 : vector<4x128xf32> to vector<4x128xbf16>
    %c0_3 = arith.constant 0 : index
    %c0_4 = arith.constant 0 : index
    %11 = vector.load %arg3[%c0_3, %c0_4] : memref<4x4xbf16, #tpu.memory_space<vmem>>, vector<4x4xbf16>
    %cst_5 = arith.constant dense<0.000000e+00> : vector<4x128xf32>
    %12 = tpu.matmul %11, %10, %cst_5 {dimension_numbers = #tpu.dot_dimension_numbers<[1], [0], [0], [1], [0, 0, 1, 1], [], []>} : vector<4x4xbf16>, vector<4x128xbf16>, vector<4x128xf32> -> vector<4x128xf32>
    %c0_6 = arith.constant 0 : index
    %c0_7 = arith.constant 0 : index
    %13 = vector.load %arg4[%c0_6, %c0_7] : memref<4x1xf32, #tpu.memory_space<vmem>>, vector<4x1xf32>
    %14 = vector.broadcast %13 : vector<4x1xf32> to vector<4x128xf32>
    %15 = arith.addf %12, %14 : vector<4x128xf32>
    %c0_8 = arith.constant 0 : index
    %c0_9 = arith.constant 0 : index
    %c0_10 = arith.constant 0 : index
    %16 = vector.load %arg5[%c0_8, %c0_9, %c0_10] : memref<1x4x128xf32, #tpu.memory_space<vmem>>, vector<1x4x128xf32>
    %17 = vector.shape_cast %16 : vector<1x4x128xf32> to vector<4x128xf32>
    %18 = vector.shape_cast %15 : vector<4x128xf32> to vector<1x4x128xf32>
    tpu.vector_store %arg5[%c0_8, %c0_9, %c0_10], %18 {strides = array<i32>} : memref<1x4x128xf32, #tpu.memory_space<vmem>>, vector<1x4x128xf32>,
    return
  }
  func.func @transform_0(%arg0: i32, %arg1: i32) -> (i32, i32, i32) {
    %c0_i32 = arith.constant 0 : i32
    %c0_i32_0 = arith.constant 0 : i32
    return %arg0, %c0_i32, %arg1 : i32, i32, i32
  }
  func.func @transform_1(%arg0: i32, %arg1: i32) -> (i32, i32) {
    %c0_i32 = arith.constant 0 : i32
    %c0_i32_0 = arith.constant 0 : i32
    %c0_i32_1 = arith.constant 0 : i32
    return %c0_i32, %c0_i32_0 : i32, i32
  }
  func.func @transform_2(%arg0: i32, %arg1: i32) -> (i32, i32) {
    %c0_i32 = arith.constant 0 : i32
    %c0_i32_0 = arith.constant 0 : i32
    %c0_i32_1 = arith.constant 0 : i32
    return %c0_i32, %c0_i32_0 : i32, i32
  }
  func.func @transform_3(%arg0: i32, %arg1: i32) -> (i32, i32, i32) {
    %c0_i32 = arith.constant 0 : i32
    %c0_i32_0 = arith.constant 0 : i32
    return %arg0, %c0_i32, %arg1 : i32, i32, i32
  }
}

</mosaic_0001>

<bundles_post_ra>
// kernel: tpu_custom_call.1
= control target key start
LH: loop header
LB: loop body
LE: loop exit
PB: predicated region body
PF: predicated region fallthrough
CT: control target
= control target key end

     0   :  { %8 = vsyncpa [#allocation3], 0  ;;  %s700_s0 = inlined_call_operand.hbm [shape: f32[2,4,128], index: 0, kind: input, shape index: {}]   ;;  %s701_s1 = inlined_call_operand.vmem [shape: bf16[4,4], index: 1, kind: input, shape index: {}]   ;;  %s702_s2 = inlined_call_operand.vmem [shape: f32[4,1], index: 2, kind: input, shape index: {}]   ;;  %s703_s3 = inlined_call_operand.hbm [shape: f32[2,4,128], index: 3, kind: output, shape index: {}]  }
   0x1   :  { %10 = vsyncpa [#allocation3 + $0x1], 0 }
   0x2   :  { %11 = vsyncpa [#allocation4], 0 }
   0x3   :  { %13 = vsyncpa [#allocation4 + $0x1], 0  ;;  %s570_s12 = smov 0   ;;  %s572_s13 = smov 0  }
   0x4   :  { %s574_s14 = smov 0   ;;  %s576_s15 = smov 0  }
   0x5   :  { %s578_s16 = smov 0   ;;  %s580_s17 = smov 0  }
   0x6 LB: > { %s355_s18 = sadd.s32 4294967295, %s547_s17   ;;  %s356_s19 = sadd.s32 4294967294, %s547_s17   ;;  %s547_s17 = sphi %s580_s17, %s19_s17   ;;  %s543_s16 = sphi %s578_s16, %s712_s16   ;;  %s539_s15 = sphi %s576_s15, %s711_s15   ;;  %s535_s14 = sphi %s574_s14, %s710_s14   ;;  %s531_s13 = sphi %s572_s13, %s709_s13   ;;  %s527_s12 = sphi %s570_s12, %s708_s12  }
   0x7   : > { %s31_s20 = sadd.s32 1, %s543_s16  ;;  %s40_s21 = sadd.s32 1, %s535_s14 }
   0x8   : > { %p33_p0 = scmp.ge.s32.totalorder %s31_s20, 2  ;;  %p47_p1 = scmp.ne.s32.totalorder %s535_s14, %s531_s13 }
   0x9   : > { %p48_p2 = scmp.eq.s32.totalorder %s547_s17, 0  ;;  %p53_p3 = scmp.ne.s32.totalorder %s531_s13, %s527_s12 }
   0xa   : > { %s714_s20 = smov (%p33_p0, %s31_s20), 0  ;;  %p54_p5 = scmp.eq.s32.totalorder %s355_s18, 0 }
   0xb   : > { %p611_p4 = por %p48_p2, %p47_p1  ;;  %s35_s23 = ssub.s32 %s543_s16, %s714_s20 }
   0xc   : > { %p121_p6 = scmp.eq.s32.totalorder %s355_s18, 1  ;;  %p38_p7 = scmp.eq.s32.totalorder %s35_s23, 0 }
   0xd   : > { %p617_p8 = por %p54_p5, %p53_p3  ;;  %p127_p10 = scmp.eq.s32.totalorder %s356_s19, 1 }
   0xe   : > { %p621_p9 = por %p121_p6, %p47_p1  ;;  %p358_p12 = scmp.ge.s32.totalorder %s547_s17, 2 }
   0xf   : > { %s626_s26 = scalar_select %p38_p7, %s535_s14, %s40_s21  }
  0x10   : > { %p628_p11 = por %p127_p10, %p53_p3  ;;  %p381_p13 = scmp.lt.s32.totalorder %s547_s17, 2 }
  0x11   : > { %s153_s28 = sand.u32 1, %s535_s14   ;;  %s360_s30 = sshll.u32 %s543_s16, 2 }
  0x12   : > { %s359_s29 = sshll.u32 %s153_s28, 2  ;;  %s162_s6 = scalar_lea.hbm %s700_s0, %s360_s30 }
  0x13   : > { %s157_s7 = scalar_lea.vmem [#allocation2], %s359_s29  ;;  %s164_s9 = sshll.u32 %s162_s6, 4  ;;  %s165_s9 = int_to_ptr.hbm [resolvable:$true] %s164_s9 }
  0x14   : > { %s166_s8 = sshll.u32 %s157_s7, 4  ;;  %p374_p0 = pnand %p381_p13, %p611_p4  ;;  %s167_s8 = int_to_ptr.vmem [resolvable:$true] %s166_s8 }
  0x15   : > { %p361_p1 = scmp.ge.s32.totalorder %s547_s17, 1  ;;  %p171_p2 = scmp.lt.s32.totalorder %s547_s17, 3 }
  0x16   : > { %s154_s10 = scalar_lea.sflag [#allocation3], %s153_s28 }
  0x17   : > { %376 = dma.hbm_to_vmem [thread:$0]  (!%p374_p0), %s165_s9, 64, %s167_s8, %s154_s10  }
  0x18   : > { %p172_p3 = pnand %p361_p1, %p171_p2 }
  0x19   : > { %s644_s11 = sand.u32 (!%p172_p3), 1, %s531_s13  }
  0x1a   : > { %175 = sbr.rel (%p172_p3) target bundleno = 210 (0xd2), region = 32  ;;  %s362_s18 = sshll.u32 (!%p172_p3), %s644_s11, 2 }
  0x1b   : > { %s178_s19 = scalar_lea.sflag (!%p172_p3), [#allocation3], %s644_s11  ;;  %s181_s21 = scalar_lea.vmem (!%p172_p3), [#allocation2], %s362_s18 }
  0x1f   : > { %518 = dma.done.wait (%p617_p8), %s178_s19, 64  }
  0x20   : > { %520 = vsyncadd (%p617_p8), %s178_s19, 4294967232  ;;  %v206_v0 = vld [vmem:[%s181_s21] sm:$0xf]  ;;  %vm208_vm0 = vcmask 1043456   ;;  %v549_v9 = vmov 0   ;;  %vm240_vm4 = vcmask 1041408  }
  0x21   : > { %v207_v1 = vmul.f32 %v206_v0, %v206_v0  ;;  %v230_v8 = vld [vmem:[%s702_s2] sm:$0xf]  ;;  %432 = vset.pattern.permute.xlu0 %v549_v9  ;;  %vm236_vm5 = vcmask 31744   ;;  %s366_s29 = sshll.u32 %s539_s15, 2  ;;  %s204_s6 = scalar_lea.vmem [#allocation5], %s362_s18 }
  0x22   : > { %233 = vperm.xlu0 %432, %v230_v8   ;;  %v229_v22 = vld [vmem:[%s701_s1] sm:$0x3]  ;;  %s270_s5 = scalar_lea.hbm %s703_s3, %s366_s29  ;;  %s272_s7 = sshll.u32 %s204_s6, 4  ;;  %s273_s7 = int_to_ptr.vmem [resolvable:$true] %s272_s7 }
  0x23   : > { %v209_v2 = vsel %vm208_vm0, %v207_v1, 0.0  ;;  %s274_s8 = sshll.u32 %s270_s5, 4  ;;  %s259_s9 = scalar_lea.sflag [#allocation4], %s644_s11  ;;  %s275_s8 = int_to_ptr.hbm [resolvable:$true] %s274_s8 }
  0x24   : > { %v210_v3 = vrot.slane %v209_v2, 4  ;;  %s479_s10 = sshra.s32 %s275_s8, 4  ;;  %s485_s22 = scalar_lea.hbm %s703_s3, 8  ;;  %s480_s10 = int_to_ptr.hbm [resolvable:$true] %s479_s10 }
  0x25   : > { %s481_s19 = scalar_lea.hbm %s480_s10, 4  ;;  %p486_p7 = scmp.lt.s32.totalorder %s480_s10, %s703_s3 }
  0x26   : > { %v211_v4 = vadd.f32 %v210_v3, %v209_v2  ;;  %p482_p4 = scmp.ne.s32.totalorder %s480_s10, %s481_s19  ;;  %p487_p8 = scmp.lt.s32.totalorder %s485_s22, %s481_s19 }
  0x28   : > { %v212_v5 = vrot.slane %v211_v4, 2  ;;  %p483_p5 = pnand %p482_p4, %p621_p9  ;;  %p488_p10 = por %p487_p8, %p486_p7 }
  0x2a   : > { %v213_v6 = vadd.f32 %v212_v5, %v211_v4  ;;  %p484_p6 = pneg %p483_p5 }
  0x2c   : > { %v214_v7 = vrot.slane %v213_v6, 1  ;;  %p489_p13 = pnand %p488_p10, %p484_p6 }
  0x2e   : > { %v215_v10 = vadd.f32 %v214_v7, %v213_v6 }
  0x30   : > { %v216_v11 = vmax.f32 %v215_v10, 1e-24 }
  0x32   : > { %433 = vrsqrt.f32 %v216_v11  ;;  %vm223_vm1 = vweird.f32 %v216_v11 }
  0x38   : > { %v434_v12 = vpop.eup %433 }
  0x39   : > { %v218_v13 = vmul.f32 %v434_v12, %v216_v11  ;;  %vm224_vm2 = vweird.f32 %v434_v12 }
  0x3a   : > { %vm225_vm3 = vmor %vm223_vm1, %vm224_vm2 }
  0x3b   : > { %v219_v14 = vmul.f32 %v434_v12, %v218_v13 }
  0x3d   : > { %v220_v15 = vmul.f32 0.5, %v219_v14 }
  0x3f   : > { %v221_v16 = vsub.f32 1.5, %v220_v15 }
  0x41   : > { %v222_v17 = vmul.f32 %v434_v12, %v221_v16 }
  0x43   : > { %v226_v18 = vsel %vm225_vm3, %v434_v12, %v222_v17 }
  0x44   : > { %v227_v19 = vmul.f32 %v226_v18, %v206_v0 }
  0x46   : > { %v228_v20 = vpack.c.bf16 %v227_v19, %v227_v19 }
  0x48   : > { %v242_v21 = vsel %vm240_vm4, %v228_v20, 0 }
  0x49   : > { %251 = vmatpush.bf16.msra.mxu0 %v242_v21 }
  0x4c   : > { %364 = vmatmul.msk.bf16.vlgmr.msra.gmra.mxu0 %vm236_vm5, %v229_v22 }
  0x94   : > { %v234_v23 = vpop.permute.xlu0 %233 }
  0xc9   : > { %v253_v24 = vpop.f32.mrf.mxu0 }
  0xca   : > { %v254_v25 = vadd.f32 %v253_v24, %v234_v23 }
  0xcc   : > { %257 = vst [vmem:[%s204_s6] sm:$0xf] %v254_v25 }
  0xcd   : > { %492 = shalt.err (!%p489_p13)
}
  0xce   : > { %371 = dma.vmem_to_hbm [thread:$0]  (%p621_p9), %s273_s7, 64, %s275_s8, %s259_s9  }
  0xd1   : > { %v255_v26 = vpop.f32.mrf.mxu0 }
  0xd2 PF: > { %s286_s11 = sand.u32 1, %s527_s12   ;;  %p378_p0 = pnand %p358_p12, %p628_p11 }
  0xd3   : > { %s287_s24 = scalar_lea.sflag [#allocation4], %s286_s11 }
  0xd4   : > { %p379_p1 = pneg %p378_p0 }
  0xd6   : > { %522 = dma.done.wait (%p379_p1), %s287_s24, 64  }
  0xd7   : > { %524 = vsyncadd (%p379_p1), %s287_s24, 4294967232  ;;  %s19_s17 = sadd.s32 1, %s547_s17   ;;  %s708_s12 = smov %s531_s13 }
  0xd8   : > { %p16_p2 = scmp.ge.s32.totalorder %s19_s17, 4   ;;  %s709_s13 = smov %s535_s14 }
  0xd9   : > { %s710_s14 = smov %s626_s26  ;;  %s711_s15 = smov %s543_s16 }
  0xda   : > { %s712_s16 = smov %s714_s20  ;;  %18 = sbr.rel (!%p16_p2) target bundleno = 6 (0x6), region = 77 }
  0xdf   :  { %293 = vsyncpa [#allocation3], 1 }
  0xe0   :  { %295 = vsyncpa [#allocation3 + $0x1], 1 }
  0xe1   :  { %296 = vsyncpa [#allocation4], 1 }
  0xe2   :  { %298 = vsyncpa [#allocation4 + $0x1], 1 }

</bundles_post_ra>
